<compile_context>
chip_gen: v5e
topology: v5e:2x2
jax: 0.10.0
libtpu: 0.0.40
codegen_flags: <defaults>
</compile_context>

<pallas_src>
import functools

import jax
import jax.numpy as jnp
from jax import lax
from jax.experimental import pallas as pl
from jax.experimental.pallas import tpu as pltpu


def _resident_spec(block_shape, index_map):
    """BlockSpec for grid-invariant operands: single-buffered (never re-fetched)."""
    try:
        return pl.BlockSpec(block_shape, index_map, pipeline_mode=pl.Buffered(1))
    except TypeError:  # older JAX without pipeline_mode: fall back to default buffering
        return pl.BlockSpec(block_shape, index_map)


def _stats_kernel(b1_ref, x_ref, w1_ref, w2_ref, y_ref, x1_ref, stats_ref, *,
                  batch, block_batch):
    """Pass 1: y = x@W1 + b1, x1 = y@W2; stash both; emit per-tile BN moments."""
    tile = pl.program_id(0)

    # fc: (BT, Din)bf16 @ (Din, Dout)bf16 -> f32 on the MXU, plain (K, N) layout.
    y = jnp.dot(x_ref[...], w1_ref[...],
                preferred_element_type=jnp.float32) + b1_ref[...]
    # cg.fc (b2 omitted: cancelled exactly by training-mode BN mean subtraction).
    x1 = jnp.dot(y.astype(jnp.bfloat16), w2_ref[...],
                 preferred_element_type=jnp.float32)

    y_ref[...] = y          # f32 stash: keeps full precision for the gating epilogue
    x1_ref[...] = x1        # f32 stash: pre-BN activation

    # Per-tile centered moments (combined with the Chan formula in the wrapper).
    # Padded rows of a ragged batch are masked out of the statistics.
    row = lax.broadcasted_iota(jnp.int32, (block_batch, 1), 0)
    valid = (tile * block_batch + row) < batch
    n = jnp.minimum(block_batch, batch - tile * block_batch).astype(jnp.float32)
    x1m = jnp.where(valid, x1, 0.0)
    s = jnp.sum(x1m, axis=0, keepdims=True)              # (1, Dout) tile sum
    mu = s * (1.0 / n)                                   # tile mean
    d = jnp.where(valid, x1 - mu, 0.0)
    m2 = jnp.sum(d * d, axis=0, keepdims=True)           # (1, Dout) tile M2
    stats_ref[...] = jnp.concatenate([s, m2], axis=0)[None]   # (1, 2, Dout)


def _apply_kernel(ss_ref, y_ref, x1_ref, o_ref):
    """Pass 2: BN folded into scale/shift -> GLU gate -> L2 normalize (no matmuls)."""
    scale = ss_ref[0:1, :]
    shift = ss_ref[1:2, :]
    x1n = x1_ref[...] * scale + shift
    g = y_ref[...] * jax.nn.sigmoid(x1n)
    # F.normalize: x / max(||x||, 1e-12)  ==  x * rsqrt(max(||x||^2, 1e-24))
    ssq = jnp.sum(g * g, axis=1, keepdims=True)
    o_ref[...] = (g * lax.rsqrt(jnp.maximum(ssq, 1e-24))).astype(o_ref.dtype)


def _round_up(n, m):
    return ((n + m - 1) // m) * m


def _default_vmem_limit_bytes():
    # Generation-aware scoped-VMEM limit: ~84% of physical (~107 MiB on v5e/v6e's
    # 128 MiB, ~53 MiB on v7x's 64 MiB). Conservative fallback if the query fails.
    try:
        return int(pltpu.get_tpu_info().vmem_capacity_bytes * 0.84)
    except Exception:
        return 48 * 1024 * 1024


def _pick_block_batch(batch, din, dout, vmem_limit):
    """Largest bf16-sublane-aligned batch tile (preferred 256) whose pass-1 working
    set fits comfortably under the scoped-VMEM limit."""
    bt = min(256, _round_up(max(batch, 1), 16))

    def working_set(bt_):
        weights = (din * dout + dout * dout) * 2       # bf16 W1 + W2, single-buffered
        bias = 8 * dout * 4                            # (1, Dout) sublane-padded
        x_tile = bt_ * din * 2 * 2                     # bf16 x, double-buffered
        stash = 2 * bt_ * dout * 4 * 2                 # y + x1 f32 outs, double-buffered
        stats = 8 * dout * 4 * 2
        return weights + bias + x_tile + stash + stats

    while bt > 16 and working_set(bt) > 0.9 * vmem_limit:
        bt //= 2
    return bt


def gated_embedding_unit(x, w1, b1, w2, b2, gamma, beta, *,
                         block_batch=None, out_dtype=jnp.float32):
    """Forward of GatedEmbeddingUnit with training-mode BatchNorm1d.

    x: (B, Din); w1: (Dout, Din); b1: (Dout,); w2: (Dout, Dout); b2: (Dout,);
    gamma/beta: (Dout,). b2 is accepted for API parity but is mathematically cancelled
    by the BN mean subtraction, so it never enters the kernels.
    """
    del b2
    B, Din = x.shape
    Dout = w1.shape[0]

    vmem_limit = _default_vmem_limit_bytes()
    BT = int(block_batch) if block_batch is not None else _pick_block_batch(
        B, Din, Dout, vmem_limit)
    num_tiles = -(-B // BT)
    B_pad = num_tiles * BT

    # One-time parameter-layout work (lives at parameter-setup time in a real model):
    # bf16 weights pre-transposed to (K, N) so the MXU matmul needs no transpose.
    w1_t = jnp.asarray(w1, jnp.bfloat16).T               # (Din, Dout)
    w2_t = jnp.asarray(w2, jnp.bfloat16).T               # (Dout, Dout)
    b1_row = jnp.asarray(b1, jnp.float32).reshape(1, Dout)

    x_bf = jnp.asarray(x, jnp.bfloat16)                  # cast once, in the wrapper
    if B_pad != B:
        x_bf = jnp.pad(x_bf, ((0, B_pad - B), (0, 0)))

    # ---------------- pass 1: matmuls + stashes + per-tile BN moments ----------------
    stats_kernel = functools.partial(_stats_kernel, batch=B, block_batch=BT)
    flops_a = 2 * B_pad * Dout * (Din + Dout)
    bytes_a = (B_pad * Din * 2 + (Din * Dout + Dout * Dout) * 2 + Dout * 4
               + 2 * B_pad * Dout * 4 + num_tiles * 2 * Dout * 4)

    y_stash, x1_stash, tile_stats = pl.pallas_call(
        stats_kernel,
        out_shape=(jax.ShapeDtypeStruct((B_pad, Dout), jnp.float32),
                   jax.ShapeDtypeStruct((B_pad, Dout), jnp.float32),
                   jax.ShapeDtypeStruct((num_tiles, 2, Dout), jnp.float32)),
        grid_spec=pltpu.PrefetchScalarGridSpec(
            num_scalar_prefetch=0,
            grid=(num_tiles,),
            in_specs=[
                _resident_spec((1, Dout), lambda j: (0, 0)),       # b1
                # x DMA overlaps two matmuls per tile; default 2-deep buffering hides it.
                pl.BlockSpec((BT, Din), lambda j: (j, 0)),         # x batch tile (bf16)
                _resident_spec((Din, Dout), lambda j: (0, 0)),     # W1^T (resident)
                _resident_spec((Dout, Dout), lambda j: (0, 0)),    # W2^T (resident)
            ],
            out_specs=[
                pl.BlockSpec((BT, Dout), lambda j: (j, 0)),        # y stash (f32)
                pl.BlockSpec((BT, Dout), lambda j: (j, 0)),        # pre-BN x1 stash
                pl.BlockSpec((1, 2, Dout), lambda j: (j, 0, 0)),   # per-tile moments
            ],
        ),
        compiler_params=pltpu.CompilerParams(
            dimension_semantics=("parallel",),    # tiles independent -> megacore-safe
            vmem_limit_bytes=vmem_limit,
        ),
        cost_estimate=pl.CostEstimate(
            flops=int(flops_a), transcendentals=0, bytes_accessed=int(bytes_a)),
    )(b1_row, x_bf, w1_t, w2_t)

    # ------------- tiny JAX-side combine: Chan parallel-variance, fold BN ------------
    counts = jnp.minimum(BT, B - jnp.arange(num_tiles) * BT).astype(jnp.float32)
    sums = tile_stats[:, 0, :]                           # (T, Dout)
    m2s = tile_stats[:, 1, :]                            # (T, Dout)
    mean = jnp.sum(sums, axis=0) / B
    tile_mean = sums / counts[:, None]
    m2 = jnp.sum(m2s, axis=0) + jnp.sum(counts[:, None] * (tile_mean - mean) ** 2,
                                        axis=0)
    var = m2 / B                                         # biased, matches BN training
    scale = jnp.asarray(gamma, jnp.float32) * lax.rsqrt(var + 1e-5)
    shift = jnp.asarray(beta, jnp.float32) - mean * scale
    scale_shift = jnp.stack([scale, shift], axis=0)      # (2, Dout)

    # ------------------- pass 2: BN affine + GLU gate + L2 normalize -----------------
    bytes_b = (2 * B_pad * Dout * 4 + 2 * Dout * 4
               + B_pad * Dout * jnp.dtype(out_dtype).itemsize)

    out_pad = pl.pallas_call(
        _apply_kernel,
        out_shape=jax.ShapeDtypeStruct((B_pad, Dout), out_dtype),
        grid_spec=pltpu.PrefetchScalarGridSpec(
            num_scalar_prefetch=0,
            grid=(num_tiles,),
            in_specs=[
                _resident_spec((2, Dout), lambda j: (0, 0)),       # scale / shift
                pl.BlockSpec((BT, Dout), lambda j: (j, 0)),        # y stash
                pl.BlockSpec((BT, Dout), lambda j: (j, 0)),        # pre-BN x1 stash
            ],
            out_specs=pl.BlockSpec((BT, Dout), lambda j: (j, 0)),
        ),
        compiler_params=pltpu.CompilerParams(
            dimension_semantics=("parallel",),
            vmem_limit_bytes=vmem_limit,
        ),
        cost_estimate=pl.CostEstimate(
            flops=int(6 * B_pad * Dout),
            transcendentals=int(B_pad * Dout + B_pad),
            bytes_accessed=int(bytes_b)),
    )(scale_shift, y_stash, x1_stash)

    return out_pad[:B] if B_pad != B else out_pad


if __name__ == "__main__":
    key0, key1 = jax.random.split(jax.random.PRNGKey(0))

    def make_inputs(key, B, Din, Dout):
        kx, k1, k2, k3, k4, k5, k6 = jax.random.split(key, 7)
        x = jax.random.normal(kx, (B, Din), jnp.float32)
        w1 = jax.random.normal(k1, (Dout, Din), jnp.float32) * (1.0 / jnp.sqrt(Din))
        b1 = 0.01 * jax.random.normal(k2, (Dout,), jnp.float32)
        w2 = jax.random.normal(k3, (Dout, Dout), jnp.float32) * (1.0 / jnp.sqrt(Dout))
        b2 = 0.01 * jax.random.normal(k4, (Dout,), jnp.float32)
        gamma = 1.0 + 0.1 * jax.random.normal(k5, (Dout,), jnp.float32)
        beta = 0.05 * jax.random.normal(k6, (Dout,), jnp.float32)
        return x, w1, b1, w2, b2, gamma, beta

    def reference(x, w1, b1, w2, b2, gamma, beta):
        # Full module semantics (b2 included; training-mode BN cancels it), with the
        # same bf16 MXU operand dtype as the kernel.
        xb = x.astype(jnp.bfloat16)
        w1r = w1.astype(jnp.bfloat16)
        w2r = w2.astype(jnp.bfloat16)
        y = lax.dot_general(xb, w1r, (((1,), (1,)), ((), ())),
                            preferred_element_type=jnp.float32) + b1
        x1 = lax.dot_general(y.astype(jnp.bfloat16), w2r, (((1,), (1,)), ((), ())),
                             preferred_element_type=jnp.float32) + b2
        mean = x1.mean(0, keepdims=True)
        var = ((x1 - mean) ** 2).mean(0, keepdims=True)
        x1n = (x1 - mean) / jnp.sqrt(var + 1e-5) * gamma + beta
        g = y * jax.nn.sigmoid(x1n)
        return g / jnp.maximum(jnp.linalg.norm(g, axis=1, keepdims=True), 1e-12)

    # Case 1: batch split into two tiles -> exercises the cross-tile stats combine.
    args1 = make_inputs(key0, B=32, Din=128, Dout=128)
    out1 = gated_embedding_unit(*args1, block_batch=16)
    jax.block_until_ready(out1)
    ref1 = reference(*args1)
    assert out1.shape == ref1.shape
    assert jnp.allclose(out1, ref1, atol=5e-4, rtol=5e-4), "case 1 mismatch vs reference"

    # Case 2: ragged batch with automatic tile choice -> exercises padding + masking of
    # the BN statistics (19 rows padded to one 32-row tile).
    args2 = make_inputs(key1, B=19, Din=64, Dout=128)
    out2 = gated_embedding_unit(*args2)
    jax.block_until_ready(out2)
    ref2 = reference(*args2)
    assert out2.shape == ref2.shape
    assert jnp.allclose(out2, ref2, atol=5e-4, rtol=5e-4), "case 2 mismatch vs reference"

    print("KERNEL_OK")
</pallas_src>

<mosaic_0001>
module attributes {stable_mosaic.version = 11 : i64} {
  func.func @_stats_kernel(%arg0: i32, %arg1: memref<1x128xf32, #tpu.memory_space<vmem>>, %arg2: memref<16x128xbf16, #tpu.memory_space<vmem>>, %arg3: memref<128x128xbf16, #tpu.memory_space<vmem>>, %arg4: memref<128x128xbf16, #tpu.memory_space<vmem>>, %arg5: memref<16x128xf32, #tpu.memory_space<vmem>>, %arg6: memref<16x128xf32, #tpu.memory_space<vmem>>, %arg7: memref<1x2x128xf32, #tpu.memory_space<vmem>>) attributes {dimension_semantics = [#tpu.dimension_semantics<parallel>], iteration_bounds = array<i64: 2>, scalar_prefetch = 0 : i64, scratch_operands = 0 : i64, tpu.core_type = #tpu.core_type<tc>, window_params = [{pipeline_mode = #tpu.pipeline_mode<synchronous>, transform_indices = @transform_0, window_bounds = array<i64: 1, 128>}, {transform_indices = @transform_1, window_bounds = array<i64: 16, 128>}, {pipeline_mode = #tpu.pipeline_mode<synchronous>, transform_indices = @transform_2, window_bounds = array<i64: 128, 128>}, {pipeline_mode = #tpu.pipeline_mode<synchronous>, transform_indices = @transform_3, window_bounds = array<i64: 128, 128>}, {transform_indices = @transform_4, window_bounds = array<i64: 16, 128>}, {transform_indices = @transform_5, window_bounds = array<i64: 16, 128>}, {transform_indices = @transform_6, window_bounds = array<i64: 1, 2, 128>}]} {
    %c0 = arith.constant 0 : index
    %c0_0 = arith.constant 0 : index
    %0 = vector.load %arg2[%c0, %c0_0] : memref<16x128xbf16, #tpu.memory_space<vmem>>, vector<16x128xbf16>
    %c0_1 = arith.constant 0 : index
    %c0_2 = arith.constant 0 : index
    %1 = vector.load %arg3[%c0_1, %c0_2] : memref<128x128xbf16, #tpu.memory_space<vmem>>, vector<128x128xbf16>
    %cst = arith.constant dense<0.000000e+00> : vector<16x128xf32>
    %2 = tpu.matmul %0, %1, %cst {dimension_numbers = #tpu.dot_dimension_numbers<[1], [0], [0], [1], [0, 0, 1, 1], [], []>} : vector<16x128xbf16>, vector<128x128xbf16>, vector<16x128xf32> -> vector<16x128xf32>
    %c0_3 = arith.constant 0 : index
    %c0_4 = arith.constant 0 : index
    %3 = vector.load %arg1[%c0_3, %c0_4] : memref<1x128xf32, #tpu.memory_space<vmem>>, vector<1x128xf32>
    %4 = vector.broadcast %3 : vector<1x128xf32> to vector<16x128xf32>
    %5 = arith.addf %2, %4 : vector<16x128xf32>
    %6 = arith.truncf %5 : vector<16x128xf32> to vector<16x128xbf16>
    %c0_5 = arith.constant 0 : index
    %c0_6 = arith.constant 0 : index
    %7 = vector.load %arg4[%c0_5, %c0_6] : memref<128x128xbf16, #tpu.memory_space<vmem>>, vector<128x128xbf16>
    %cst_7 = arith.constant dense<0.000000e+00> : vector<16x128xf32>
    %8 = tpu.matmul %6, %7, %cst_7 {dimension_numbers = #tpu.dot_dimension_numbers<[1], [0], [0], [1], [0, 0, 1, 1], [], []>} : vector<16x128xbf16>, vector<128x128xbf16>, vector<16x128xf32> -> vector<16x128xf32>
    %c0_8 = arith.constant 0 : index
    %c0_9 = arith.constant 0 : index
    %9 = vector.load %arg5[%c0_8, %c0_9] : memref<16x128xf32, #tpu.memory_space<vmem>>, vector<16x128xf32>
    tpu.vector_store %arg5[%c0_8, %c0_9], %5 {strides = array<i32>} : memref<16x128xf32, #tpu.memory_space<vmem>>, vector<16x128xf32>,
    %c0_10 = arith.constant 0 : index
    %c0_11 = arith.constant 0 : index
    %10 = vector.load %arg6[%c0_10, %c0_11] : memref<16x128xf32, #tpu.memory_space<vmem>>, vector<16x128xf32>
    tpu.vector_store %arg6[%c0_10, %c0_11], %8 {strides = array<i32>} : memref<16x128xf32, #tpu.memory_space<vmem>>, vector<16x128xf32>,
    %11 = tpu.iota {dimensions = array<i32: 0>} : vector<16x1xi32>
    %c16_i32 = arith.constant 16 : i32
    %12 = arith.muli %arg0, %c16_i32 : i32
    %13 = vector.broadcast %12 : i32 to vector<16x1xi32>
    %14 = arith.addi %13, %11 : vector<16x1xi32>
    %c32_i32 = arith.constant 32 : i32
    %15 = vector.broadcast %c32_i32 : i32 to vector<16x1xi32>
    %16 = arith.cmpi slt, %14, %15 : vector<16x1xi32>
    %c16_i32_12 = arith.constant 16 : i32
    %17 = arith.muli %arg0, %c16_i32_12 : i32
    %c32_i32_13 = arith.constant 32 : i32
    %18 = arith.subi %c32_i32_13, %17 : i32
    %c16_i32_14 = arith.constant 16 : i32
    %19 = arith.minsi %c16_i32_14, %18 : i32
    %20 = arith.sitofp %19 : i32 to f32
    %cst_15 = arith.constant 0.000000e+00 : f32
    %21 = vector.shape_cast %16 : vector<16x1xi1> to vector<16x1xi1>
    %22 = vector.broadcast %21 : vector<16x1xi1> to vector<16x128xi1>
    %23 = vector.broadcast %cst_15 : f32 to vector<16x128xf32>
    %24 = arith.select %22, %8, %23 : vector<16x128xi1>, vector<16x128xf32>
    %cst_16 = arith.constant dense<0.000000e+00> : vector<128xf32>
    %25 = vector.multi_reduction <add>, %24, %cst_16 [0] : vector<16x128xf32> to vector<128xf32>
    %26 = vector.shape_cast %25 : vector<128xf32> to vector<1x128xf32>
    %cst_17 = arith.constant 1.000000e+00 : f32
    %27 = arith.divf %cst_17, %20 : f32
    %28 = vector.broadcast %27 : f32 to vector<1x128xf32>
    %29 = arith.mulf %26, %28 : vector<1x128xf32>
    %30 = vector.broadcast %29 : vector<1x128xf32> to vector<16x128xf32>
    %31 = arith.subf %8, %30 : vector<16x128xf32>
    %cst_18 = arith.constant 0.000000e+00 : f32
    %32 = vector.shape_cast %16 : vector<16x1xi1> to vector<16x1xi1>
    %33 = vector.broadcast %32 : vector<16x1xi1> to vector<16x128xi1>
    %34 = vector.broadcast %cst_18 : f32 to vector<16x128xf32>
    %35 = arith.select %33, %31, %34 : vector<16x128xi1>, vector<16x128xf32>
    %36 = arith.mulf %35, %35 : vector<16x128xf32>
    %cst_19 = arith.constant dense<0.000000e+00> : vector<128xf32>
    %37 = vector.multi_reduction <add>, %36, %cst_19 [0] : vector<16x128xf32> to vector<128xf32>
    %38 = vector.shape_cast %37 : vector<128xf32> to vector<1x128xf32>
    %39 = tpu.concatenate %26, %38 in 0 : vector<1x128xf32>, vector<1x128xf32> -> vector<2x128xf32>
    %40 = vector.shape_cast %39 : vector<2x128xf32> to vector<1x2x128xf32>
    %c0_20 = arith.constant 0 : index
    %c0_21 = arith.constant 0 : index
    %c0_22 = arith.constant 0 : index
    %41 = vector.load %arg7[%c0_20, %c0_21, %c0_22] : memref<1x2x128xf32, #tpu.memory_space<vmem>>, vector<1x2x128xf32>
    tpu.vector_store %arg7[%c0_20, %c0_21, %c0_22], %40 {strides = array<i32>} : memref<1x2x128xf32, #tpu.memory_space<vmem>>, vector<1x2x128xf32>,
    return
  }
  func.func @transform_0(%arg0: i32) -> (i32, i32) {
    %c0_i32 = arith.constant 0 : i32
    %c0_i32_0 = arith.constant 0 : i32
    %c0_i32_1 = arith.constant 0 : i32
    return %c0_i32, %c0_i32_0 : i32, i32
  }
  func.func @transform_1(%arg0: i32) -> (i32, i32) {
    %c0_i32 = arith.constant 0 : i32
    %c0_i32_0 = arith.constant 0 : i32
    return %arg0, %c0_i32 : i32, i32
  }
  func.func @transform_2(%arg0: i32) -> (i32, i32) {
    %c0_i32 = arith.constant 0 : i32
    %c0_i32_0 = arith.constant 0 : i32
    %c0_i32_1 = arith.constant 0 : i32
    return %c0_i32, %c0_i32_0 : i32, i32
  }
  func.func @transform_3(%arg0: i32) -> (i32, i32) {
    %c0_i32 = arith.constant 0 : i32
    %c0_i32_0 = arith.constant 0 : i32
    %c0_i32_1 = arith.constant 0 : i32
    return %c0_i32, %c0_i32_0 : i32, i32
  }
  func.func @transform_4(%arg0: i32) -> (i32, i32) {
    %c0_i32 = arith.constant 0 : i32
    %c0_i32_0 = arith.constant 0 : i32
    return %arg0, %c0_i32 : i32, i32
  }
  func.func @transform_5(%arg0: i32) -> (i32, i32) {
    %c0_i32 = arith.constant 0 : i32
    %c0_i32_0 = arith.constant 0 : i32
    return %arg0, %c0_i32 : i32, i32
  }
  func.func @transform_6(%arg0: i32) -> (i32, i32, i32) {
    %c0_i32 = arith.constant 0 : i32
    %c0_i32_0 = arith.constant 0 : i32
    %c0_i32_1 = arith.constant 0 : i32
    return %arg0, %c0_i32, %c0_i32_0 : i32, i32, i32
  }
}

</mosaic_0001>

<bundles_post_ra>
// kernel: tpu_custom_call.1
= control target key start
LH: loop header
LB: loop body
LE: loop exit
PB: predicated region body
PF: predicated region fallthrough
CT: control target
= control target key end

     0   :  { %12 = vsyncpa [#allocation3], 0  ;;  %s1550_s0 = inlined_call_operand.hbm [shape: f32[1,128], index: 0, kind: input, shape index: {}]   ;;  %s1551_s1 = inlined_call_operand.hbm [shape: bf16[32,128], index: 1, kind: input, shape index: {}]   ;;  %s1552_s2 = inlined_call_operand.hbm [shape: bf16[128,128], index: 2, kind: input, shape index: {}]   ;;  %s1553_s3 = inlined_call_operand.hbm [shape: bf16[128,128], index: 3, kind: input, shape index: {}]   ;;  %s1554_s4 = inlined_call_operand.hbm [shape: f32[32,128], index: 4, kind: output, shape index: {0}]   ;;  %s1555_s5 = inlined_call_operand.hbm [shape: f32[32,128], index: 5, kind: output, shape index: {1}]   ;;  %s1556_s6 = inlined_call_operand.hbm [shape: f32[2,2,128], index: 6, kind: output, shape index: {2}]  }
   0x1   :  { %13 = vsyncpa [#allocation6], 0 }
   0x2   :  { %15 = vsyncpa [#allocation6 + $0x1], 0 }
   0x3   :  { %16 = vsyncpa [#allocation9], 0 }
   0x4   :  { %17 = vsyncpa [#allocation4], 0 }
   0x5   :  { %19 = vsyncpa [#allocation4 + $0x1], 0 }
   0x6   :  { %20 = vsyncpa [#allocation12], 0 }
   0x7   :  { %22 = vsyncpa [#allocation12 + $0x1], 0  ;;  %s1312_s21 = smov 0   ;;  %s1314_s22 = smov 0  }
   0x8   :  { %s1316_s23 = smov 0   ;;  %s1318_s24 = smov 0  }
   0x9 LB: > { %s1333_s25 = sadd.s32 4294967295, %s1268_s24   ;;  %s1557_s26 = sadd.s32 4294967294, %s1268_s24   ;;  %s1268_s24 = sphi %s1318_s24, %s1577_s24   ;;  %s1264_s23 = sphi %s1316_s23, %s1576_s23   ;;  %s1260_s22 = sphi %s1314_s22, %s1575_s22   ;;  %s1256_s21 = sphi %s1312_s21, %s1574_s21  }
   0xa   : > { %p69_p0 = scmp.ne.s32.totalorder %s1260_s22, %s1256_s21  ;;  %p70_p1 = scmp.eq.s32.totalorder %s1333_s25, 0 }
   0xb   : > { %p135_p2 = scmp.eq.s32.totalorder %s1333_s25, 1  ;;  %p141_p3 = scmp.eq.s32.totalorder %s1557_s26, 1 }
   0xc   : > { %p1344_p4 = por %p70_p1, %p69_p0  ;;  %p799_p5 = scmp.ge.s32.totalorder %s1268_s24, 1 }
   0xd   : > { %p1349_p6 = por %p141_p3, %p69_p0  ;;  %p200_p7 = scmp.lt.s32.totalorder %s1268_s24, 3 }
   0xe   : > { %s223_s7 = sshll.u32 %s1552_s2, 4  ;;  %s1270_s9 = smov [#allocation7]   ;;  %s224_s7 = int_to_ptr.hbm [resolvable:$true] %s223_s7 }
   0xf   : > { %p1357_p8 = pnand %p799_p5, %p200_p7  ;;  %s225_s10 = sshll.u32 %s1270_s9, 4  ;;  %s226_s10 = int_to_ptr.vmem [resolvable:$true] %s225_s10 }
  0x10   : > { %s212_s14 = sshll.u32 %s1550_s0, 4  ;;  %s1558_s15 = smov 64   ;;  %s213_s14 = int_to_ptr.hbm [resolvable:$true] %s212_s14 }
  0x11   : > { %p936_p9 = pneg %p1357_p8  ;;  %s1559_s16 = smov 4  }
  0x12   : > { %s1273_s17 = smov [#allocation2]   ;;  %s237_s29 = sshll.u32 %s1553_s3, 4  ;;  %s238_s29 = int_to_ptr.hbm [resolvable:$true] %s237_s29 }
  0x13   : > { %p1365_p10 = pnand %p936_p9, %p70_p1  ;;  %s214_s18 = sshll.u32 %s1273_s17, 4  ;;  %s215_s18 = int_to_ptr.vmem [resolvable:$true] %s214_s18 }
  0x14   : > { %s1274_s30 = smov [#allocation8]   ;;  %s56_s12 = sadd.s32 1, %s1264_s23 }
  0x15   : > { %942 = dma.hbm_to_vmem [thread:$0]  (!%p1365_p10), %s224_s7, 1024, %s226_s10, [#allocation6], %s1558_s15, %s1558_s15, %s1559_s16  }
  0x16   : > { %939 = dma.hbm_to_vmem [thread:$0]  (!%p1365_p10), %s213_s14, 16, %s215_s18, [#allocation3]  }
  0x17   : > { %s239_s9 = sshll.u32 %s1274_s30, 4  ;;  %s1384_s7 = sadd.s32 1, %s1268_s24   ;;  %s240_s9 = int_to_ptr.vmem [resolvable:$true] %s239_s9 }
  0x18   : > { %945 = dma.hbm_to_vmem [thread:$0]  (!%p1365_p10), %s238_s29, 1024, %s240_s9, [#allocation9], %s1558_s15, %s1558_s15, %s1559_s16  }
  0x19   : > { %s53_s10 = ssub.s32 %s1268_s24, %s1384_s7  ;;  %p63_p13 = scmp.ne.s32.totalorder %s1264_s23, %s1260_s22 }
  0x1a   : > { %p54_p12 = scmp.eq.s32.totalorder %s53_s10, 0  ;;  %p64_p0 = scmp.eq.s32.totalorder %s1268_s24, 0 }
  0x1b   : > { %p963_p3 = scmp.lt.s32.totalorder %s1268_s24, 2  ;;  %p1403_p7 = por %p135_p2, %p63_p13 }
  0x1c   : > { %s1399_s13 = scalar_select %p54_p12, %s1264_s23, %s56_s12  }
  0x1d   : > { %p65_p5 = por %p64_p0, %p63_p13  ;;  %s253_s11 = sand.u32 1, %s1268_s24  }
  0x1e   : > { %s255_s17 = sand.u32 1, %s1264_s23   ;;  %s894_s19 = sshll.u32 %s1268_s24, 3 }
  0x1f   : > { %s804_s18 = sshll.u32 %s255_s17, 3  ;;  %s262_s30 = scalar_lea.hbm %s1551_s1, %s894_s19 }
  0x20   : > { %s257_s9 = scalar_lea.vmem [#allocation5], %s804_s18  ;;  %s263_s26 = sshll.u32 %s262_s30, 4  ;;  %s264_s26 = int_to_ptr.hbm [resolvable:$true] %s263_s26 }
  0x21   : > { %s265_s10 = sshll.u32 %s257_s9, 4  ;;  %p1415_p9 = pnand %p963_p3, %p65_p5  ;;  %s266_s10 = int_to_ptr.vmem [resolvable:$true] %s265_s10 }
  0x22   : > { %s254_s15 = scalar_lea.sflag [#allocation6], %s253_s11  ;;  %s1100_s16 = sshra.s32 %s264_s26, 4  ;;  %s1101_s16 = int_to_ptr.hbm [resolvable:$true] %s1100_s16 }
  0x23   : > { %s1102_s17 = scalar_lea.hbm %s1101_s16, 8  ;;  %p1104_p10 = pneg %p1415_p9 }
  0x24   : > { %p1103_p2 = scmp.ne.s32.totalorder %s1101_s16, %s1102_s17  ;;  %s1107_s20 = scalar_lea.hbm %s1551_s1, 16 }
  0x25   : > { %p1108_p0 = scmp.lt.s32.totalorder %s1101_s16, %s1551_s1  ;;  %p1109_p3 = scmp.lt.s32.totalorder %s1107_s20, %s1102_s17 }
  0x26   : > { %p1105_p12 = pnand %p1104_p10, %p1103_p2 }
  0x27   : > { %p1110_p5 = por %p1109_p3, %p1108_p0 }
  0x28   : > { %p1106_p13 = pneg %p1105_p12 }
  0x2a   : > { %p1111_p11 = pnand %p1110_p5, %p1106_p13 }
  0x2c   : > { %1114 = shalt.err (!%p1111_p11)
}
  0x2d   : > { %s1568_s11 = smov 4   ;;  %s1569_s9 = smov 64  }
  0x2e   : > { %949 = dma.hbm_to_vmem [thread:$0]  (!%p1415_p9), %s264_s26, 128, %s266_s10, %s254_s15, %s1569_s9, %s1569_s9, %s1568_s11  }
  0x2f   : > { %277 = sbr.rel (%p1357_p8) target bundleno = 405 (0x195), region = 36 }
  0x34   : > { %1231 = dma.done.wait (%p70_p1), [#allocation3], 16  }
  0x35   : > { %1233 = vsyncadd (%p70_p1), [#allocation3], 4294967280  ;;  %s1560_s16 = sand.u32 1, %s1333_s25   ;;  %s1440_s17 = sand.u32 1, %s1260_s22  }
  0x36   : > { %s809_s12 = sshll.u32 %s1440_s17, 3  ;;  %s285_s26 = scalar_lea.sflag [#allocation6], %s1560_s16 }
  0x37   : > { %s1445_s15 = scalar_lea.vmem [#allocation5], %s809_s12 }
  0x38   : > { %1235 = dma.done.wait (%p1344_p4), %s285_s26, 128  }
  0x39   : > { %1237 = vsyncadd (%p1344_p4), %s285_s26, 4294967168 }
  0x3a   : > { %1239 = dma.done.wait (%p70_p1), [#allocation6], 1024  }
  0x3b   : > { %1241 = vsyncadd (%p70_p1), [#allocation6], 4294966272 }
  0x3c   : > { %1243 = dma.done.wait (%p70_p1), [#allocation9], 1024  }
  0x3d   : > { %1245 = vsyncadd (%p70_p1), [#allocation9], 4294966272  ;;  %v903_v0 = vld [vmem:[#allocation7 + $0x38] sm:$0xff]  ;;  %v902_v1 = vld [vmem:[#allocation7 + $0x30] sm:$0xff]  ;;  %s1461_s27 = sshll.u32 %s1333_s25, 4  ;;  %s1561_s18 = sshll.u32 %s1440_s17, 4 }
  0x3e   : > { %417 = vmatpush.bf16.msra.mxu0 %v903_v0  ;;  %v911_v2 = vld [vmem:[#allocation8 + $0x38] sm:$0xff]  ;;  %v910_v3 = vld [vmem:[#allocation8 + $0x30] sm:$0xff]  ;;  %v901_v4 = vld [vmem:[#allocation7 + $0x28] sm:$0xff]  ;;  %s523_s8 = ssub.s32 32, %s1461_s27  ;;  %s323_s19 = scalar_lea.vmem [#allocation10], %s1561_s18 }
  0x3f   : > { %496 = vmatpush.bf16.msra.mxu1 %v911_v2  ;;  %v909_v5 = vld [vmem:[#allocation8 + $0x28] sm:$0xff]  ;;  %v900_v6 = vld [vmem:[#allocation7 + $0x20] sm:$0xff]  ;;  %v899_v8 = vld [vmem:[#allocation7 + $0x18] sm:$0xff]  ;;  %p524_p1 = scmp.lt.s32.totalorder %s523_s8, 16  ;;  %s597_s20 = sshll.u32 %s323_s19, 4  ;;  %s598_s20 = int_to_ptr.vmem [resolvable:$true] %s597_s20 }
  0x40   : > { %v908_v7 = vld [vmem:[#allocation8 + $0x20] sm:$0xff]  ;;  %v907_v9 = vld [vmem:[#allocation8 + $0x18] sm:$0xff]  ;;  %v898_v10 = vld [vmem:[#allocation7 + $0x10] sm:$0xff]  ;;  %s596_s11 = scalar_lea.hbm %s1554_s4, %s1461_s27  ;;  %s575_s12 = scalar_lea.sflag [#allocation4], %s1440_s17 }
  0x41   : > { %v897_v11 = vld [vmem:[#allocation7 + $0x8] sm:$0xff]  ;;  %v896_v12 = vld [vmem:[#allocation7] sm:$0xff]  ;;  %v895_v13 = vld [vmem:[%s1445_s15] sm:$0xff]  ;;  %s1579_s8 = smov (!%p524_p1, %s523_s8), 16  ;;  %s599_s9 = sshll.u32 %s596_s11, 4  ;;  %s600_s9 = int_to_ptr.hbm [resolvable:$true] %s599_s9 }
  0x42   : > { %418 = vmatpush.bf16.msra.mxu0 %v902_v1  ;;  %v906_v14 = vld [vmem:[#allocation8 + $0x10] sm:$0xff]  ;;  %v905_v15 = vld [vmem:[#allocation8 + $0x8] sm:$0xff]  ;;  %v904_v16 = vld [vmem:[#allocation8] sm:$0xff]  ;;  %s526_s10 = scvt.s32.f32 %s1579_s8  ;;  %s1144_s26 = sshra.s32 %s600_s9, 4  ;;  %s1145_s26 = int_to_ptr.hbm [resolvable:$true] %s1144_s26 }
  0x43   : > { %497 = vmatpush.bf16.msra.mxu1 %v910_v3  ;;  %v1007_v26 = vld [vmem:[#allocation2] ss:$0 sm:$0xff]  ;;  %s1146_s15 = scalar_lea.hbm %s1145_s26, 16  ;;  %s1150_s16 = scalar_lea.hbm %s1554_s4, 32 }
  0x44   : > { %v540_v17 = vstv %s526_s10  ;;  %p1147_p4 = scmp.ne.s32.totalorder %s1145_s26, %s1146_s15  ;;  %p1151_p9 = scmp.lt.s32.totalorder %s1145_s26, %s1554_s4 }
  0x45   : > { %1008 = vrcp.f32 %v540_v17  ;;  %v552_v20 = vand.u32 2147483648, %v540_v17  ;;  %vm546_vm0 = vweird.f32 %v540_v17  ;;  %v550_v22 = vand.u32 2147483647, %v540_v17  ;;  %p1152_p2 = scmp.lt.s32.totalorder %s1150_s16, %s1146_s15 }
  0x46   : > { %419 = vmatpush.bf16.msra.mxu0 %v901_v4  ;;  %p1148_p8 = pnand %p1147_p4, %p1403_p7 }
  0x47   : > { %498 = vmatpush.bf16.msra.mxu1 %v909_v5  ;;  %v553_v24 = vor.u32 1.1754944e-38, %v552_v20  ;;  %vm551_vm3 = vcmp.eq.f32.partialorder %v550_v22, 8.507059e+37  ;;  %p1153_p10 = por %p1152_p2, %p1151_p9 }
  0x48   : > { %p1149_p11 = pneg %p1148_p8 }
  0x4a   : > { %420 = vmatpush.bf16.msra.mxu0 %v900_v6  ;;  %p1154_p12 = pnand %p1153_p10, %p1149_p11 }
  0x4b   : > { %499 = vmatpush.bf16.msra.mxu1 %v908_v7  ;;  %v1009_v18 = vpop.eup %1008 }
  0x4c   : > { %v542_v19 = vmul.f32 %v1009_v18, %v540_v17  ;;  %vm547_vm1 = vweird.f32 %v1009_v18 }
  0x4d   : > { %vm548_vm2 = vmor %vm546_vm0, %vm547_vm1 }
  0x4e   : > { %421 = vmatpush.bf16.msra.mxu0 %v899_v8  ;;  %v543_v21 = vsub.f32 1.0, %v542_v19 }
  0x4f   : > { %500 = vmatpush.bf16.msra.mxu1 %v907_v9 }
  0x50   : > { %v544_v23 = vmul.f32 %v1009_v18, %v543_v21 }
  0x52   : > { %422 = vmatpush.bf16.msra.mxu0 %v898_v10  ;;  %v545_v25 = vadd.f32 %v1009_v18, %v544_v23 }
  0x53   : > { %501 = vmatpush.bf16.msra.mxu1 %v906_v14 }
  0x54   : > { %v549_v27 = vsel %vm548_vm2, %v1009_v18, %v545_v25 }
  0x55   : > { %v554_v28 = vsel %vm551_vm3, %v553_v24, %v549_v27 }
  0x56   : > { %423 = vmatpush.bf16.msra.mxu0 %v897_v11  ;;  %914 = vpush %v554_v28 }
  0x57   : > { %502 = vmatpush.bf16.msra.mxu1 %v905_v15 }
  0x5a   : > { %424 = vmatpush.bf16.msra.mxu0 %v896_v12 }
  0x5b   : > { %503 = vmatpush.bf16.msra.mxu1 %v904_v16 }
  0x5d   : > { %425 = vmatmul.bf16.vlgmr.msra.gmra.mxu0 %v895_v13 }
  0xda   : > { %v426_v29 = vpop.f32.mrf.mxu0 }
  0xdb   : > { %v427_v30 = vadd.f32 %v1007_v26, %v426_v29 }
  0xdd   : > { %510 = vst [vmem:[%s323_s19] sm:$0xff] %v427_v30 }
  0xe2   : > { %v428_v31 = vpop.f32.mrf.mxu0 }
  0xe3   : > { %v429_v32 = vadd.f32 %v1007_v26, %v428_v31 }
  0xe5   : > { %511 = vst [vmem:[%s323_s19 + $0x8] sm:$0xff] %v429_v32  ;;  %v431_v33 = vpack.c.bf16 %v429_v32, %v427_v30 }
  0xe7   : > { %504 = vmatmul.bf16.vlgmr.msra.gmra.mxu1 %v431_v33 }
  0xe8   : > { %1157 = shalt.err (!%p1154_p12)
}
  0xe9   : > { %s1275_s29 = smov 128   ;;  %s1276_s30 = smov 8   ;;  %v514_v34 = vlaneseq  ;;  %v518_v37 = vstv %s1461_s27 }
  0xea   : > { %930 = dma.vmem_to_hbm [thread:$0]  (%p1403_p7), %s598_s20, 256, %s600_s9, %s575_s12, %s1275_s29, %s1275_s29, %s1276_s30  }
  0xeb   : > { %v515_v35 = vshrl.u32 %v514_v34, 7  ;;  %s1570_s16 = sshll.u32 %s1440_s17, 4  ;;  %s613_s15 = scalar_lea.hbm %s1555_s5, %s1461_s27 }
  0xec   : > { %s330_s18 = scalar_lea.vmem [#allocation11], %s1570_s16  ;;  %s616_s10 = sshll.u32 %s613_s15, 4  ;;  %s617_s10 = int_to_ptr.hbm [resolvable:$true] %s616_s10 }
  0xed   : > { %v516_v36 = vadd.s32 8, %v515_v35  ;;  %v519_v39 = vadd.s32 %v518_v37, %v515_v35  ;;  %s614_s8 = sshll.u32 %s330_s18, 4  ;;  %s1571_s20 = sand.u32 1, %s1333_s25   ;;  %s615_s8 = int_to_ptr.vmem [resolvable:$true] %s614_s8 }
  0xee   : > { %s1496_s9 = scalar_lea.sflag [#allocation12], %s1571_s20  ;;  %s1172_s27 = sshra.s32 %s617_s10, 4  ;;  %s1173_s27 = int_to_ptr.hbm [resolvable:$true] %s1172_s27 }
  0xef   : > { %v520_v40 = vadd.s32 %v518_v37, %v516_v36  ;;  %vm521_vm4 = vcmp.lt.s32.totalorder %v519_v39, 32  ;;  %s1174_s12 = scalar_lea.hbm %s1173_s27, 16  ;;  %s1178_s11 = scalar_lea.hbm %s1555_s5, 32 }
  0xf0   : > { %p1175_p13 = scmp.ne.s32.totalorder %s1173_s27, %s1174_s12  ;;  %p1179_p5 = scmp.lt.s32.totalorder %s1173_s27, %s1555_s5 }
  0xf1   : > { %vm522_vm5 = vcmp.lt.s32.totalorder %v520_v40, 32  ;;  %p1180_p1 = scmp.lt.s32.totalorder %s1178_s11, %s1174_s12 }
  0xf2   : > { %p1176_p0 = pnand %p1175_p13, %p1403_p7 }
  0xf3   : > { %p1181_p4 = por %p1180_p1, %p1179_p5 }
  0xf4   : > { %p1177_p3 = pneg %p1176_p0 }
  0xf6   : > { %p1182_p8 = pnand %p1181_p4, %p1177_p3 }
 0x164   : > { %v505_v38 = vpop.f32.mrf.mxu1 }
 0x165   : > { %512 = vst [vmem:[%s330_s18] sm:$0xff] %v505_v38  ;;  %v531_v42 = vsel %vm521_vm4, %v505_v38, 0.0 }
 0x16c   : > { %v507_v41 = vpop.f32.mrf.mxu1 }
 0x16d   : > { %513 = vst [vmem:[%s330_s18 + $0x8] sm:$0xff] %v507_v41  ;;  %v532_v43 = vsel %vm522_vm5, %v507_v41, 0.0 }
 0x16e   : > { %v533_v44 = vadd.f32 %v532_v43, %v531_v42 }
 0x16f   : > { %1185 = shalt.err (!%p1182_p8)
}
 0x170   : > { %931 = dma.vmem_to_hbm [thread:$0]  (%p1403_p7), %s615_s8, 256, %s617_s10, %s1496_s9, %s1275_s29, %s1275_s29, %s1276_s30   ;;  %v534_v45 = vrot.slane %v533_v44, 4  ;;  %vm571_vm6 = vcmask 1040384  }
 0x171   : > { %s915_s18 = spop %914  ;;  %s814_s29 = sshll.u32 %s1440_s17, 1 }
 0x172   : > { %v535_v46 = vadd.f32 %v534_v45, %v533_v44  ;;  %v556_v50 = vstv %s915_s18  ;;  %s891_s30 = sshll.u32 %s1333_s25, 1  ;;  %s337_s27 = scalar_lea.vmem [#allocation13], %s814_s29 }
 0x173   : > { %s629_s20 = scalar_lea.hbm %s1556_s6, %s891_s30  ;;  %s631_s12 = sshll.u32 %s337_s27, 4  ;;  %s632_s12 = int_to_ptr.vmem [resolvable:$true] %s631_s12 }
 0x174   : > { %v536_v47 = vrot.slane %v535_v46, 2  ;;  %s633_s19 = sshll.u32 %s629_s20, 4  ;;  %s1206_s26 = scalar_lea.hbm %s1556_s6, 4  ;;  %s634_s19 = int_to_ptr.hbm [resolvable:$true] %s633_s19 }
 0x175   : > { %s1200_s16 = sshra.s32 %s634_s19, 4  ;;  %s1201_s16 = int_to_ptr.hbm [resolvable:$true] %s1200_s16 }
 0x176   : > { %v537_v48 = vadd.f32 %v536_v47, %v535_v46  ;;  %s1202_s25 = scalar_lea.hbm %s1201_s16, 2  ;;  %p1207_p10 = scmp.lt.s32.totalorder %s1201_s16, %s1556_s6 }
 0x177   : > { %p1203_p11 = scmp.ne.s32.totalorder %s1201_s16, %s1202_s25  ;;  %p1208_p12 = scmp.lt.s32.totalorder %s1206_s26, %s1202_s25 }
 0x178   : > { %v538_v49 = vrot.slane %v537_v48, 1 }
 0x179   : > { %p1204_p9 = pnand %p1203_p11, %p1403_p7  ;;  %p1209_p13 = por %p1208_p12, %p1207_p10 }
 0x17a   : > { %v539_v51 = vadd.f32 %v538_v49, %v537_v48 }
 0x17b   : > { %p1205_p2 = pneg %p1204_p9 }
 0x17c   : > { %v557_v52 = vmul.f32 %v556_v50, %v539_v51 }
 0x17d   : > { %p1210_p0 = pnand %p1209_p13, %p1205_p2 }
 0x17e   : > { %v558_v53 = vsub.f32 %v505_v38, %v557_v52  ;;  %v559_v54 = vsub.f32 %v507_v41, %v557_v52 }
 0x180   : > { %v560_v55 = vsel %vm521_vm4, %v558_v53, 0.0  ;;  %v561_v56 = vsel %vm522_vm5, %v559_v54, 0.0 }
 0x181   : > { %v562_v57 = vmul.f32 %v560_v55, %v560_v55  ;;  %v563_v58 = vmul.f32 %v561_v56, %v561_v56 }
 0x183   : > { %v564_v59 = vadd.f32 %v563_v58, %v562_v57 }
 0x185   : > { %v565_v60 = vrot.slane %v564_v59, 4 }
 0x187   : > { %v566_v61 = vadd.f32 %v565_v60, %v564_v59 }
 0x189   : > { %v567_v62 = vrot.slane %v566_v61, 2 }
 0x18b   : > { %v568_v63 = vadd.f32 %v567_v62, %v566_v61 }
 0x18d   : > { %v569_v0 = vrot.slane %v568_v63, 1 }
 0x18f   : > { %v570_v1 = vadd.f32 %v569_v0, %v568_v63 }
 0x191   : > { %v572_v2 = vsel %vm571_vm6, %v539_v51, %v570_v1 }
 0x192   : > { %573 = vst [vmem:[%s337_s27] sm:$0x3] %v572_v2 }
 0x193   : > { %1213 = shalt.err (!%p1210_p0)
}
 0x194   : > { %932 = dma.vmem_to_hbm [thread:$0]  (%p1403_p7), %s632_s12, 32, %s634_s19, %s1496_s9  }
 0x195 PF: > { %s645_s29 = sand.u32 1, %s1256_s21   ;;  %p1572_p3 = scmp.ge.s32.totalorder %s1268_s24, 2 }
 0x196   : > { %s646_s30 = scalar_lea.sflag [#allocation4], %s645_s29 }
 0x197   : > { %p951_p5 = pnand %p1572_p3, %p1349_p6 }
 0x199   : > { %p952_p1 = pneg %p951_p5 }
 0x19b   : > { %1247 = dma.done.wait (%p952_p1), %s646_s30, 256  }
 0x19c   : > { %1249 = vsyncadd (%p952_p1), %s646_s30, 4294967040  ;;  %s1573_s8 = sadd.s32 4294967294, %s1268_s24  }
 0x19d   : > { %s655_s10 = sand.u32 1, %s1573_s8  }
 0x19e   : > { %s656_s20 = scalar_lea.sflag [#allocation12], %s655_s10 }
 0x19f   : > { %1251 = dma.done.wait (%p952_p1), %s656_s20, 288  }
 0x1a0   : > { %1253 = vsyncadd (%p952_p1), %s656_s20, 4294967008  ;;  %p25_p7 = scmp.ge.s32.totalorder %s1384_s7, 4   ;;  %s1574_s21 = smov %s1260_s22 }
 0x1a1   : > { %s1575_s22 = smov %s1264_s23  ;;  %s1576_s23 = smov %s1399_s13 }
 0x1a2   : > { %s1577_s24 = smov %s1384_s7  ;;  %27 = sbr.rel (!%p25_p7) target bundleno = 9 (0x9), region = 126 }
 0x1a7   :  { %672 = vsyncpa [#allocation3], 1 }
 0x1a8   :  { %674 = vsyncpa [#allocation3 + $0x1], 1 }
 0x1a9   :  { %675 = vsyncpa [#allocation6], 1 }
 0x1aa   :  { %677 = vsyncpa [#allocation6 + $0x1], 1 }
 0x1ab   :  { %678 = vsyncpa [#allocation9], 1 }
 0x1ac   :  { %679 = vsyncpa [#allocation4], 1 }
 0x1ad   :  { %681 = vsyncpa [#allocation4 + $0x1], 1 }
 0x1ae   :  { %682 = vsyncpa [#allocation12], 1 }
 0x1af   :  { %684 = vsyncpa [#allocation12 + $0x1], 1 }

</bundles_post_ra>
